<compile_context>
chip_gen: v6e
topology: v6e:2x2x1
jax: 0.10.0
libtpu: 0.0.40
codegen_flags: <defaults>
</compile_context>

<pallas_src>
import functools

import jax
import jax.numpy as jnp
from jax.experimental import pallas as pl
from jax.experimental.pallas import tpu as pltpu


def _round_up(x, m):
    return ((x + m - 1) // m) * m


def _cdiv(a, b):
    return -(-a // b)


# ---------------------------------------------------------------------------
# Kernels
# ---------------------------------------------------------------------------
def sgc_kernel_fullk(x_ref, w_ref, b_ref, o_ref):
    # x_ref: (tm, nfeat)   w_ref: (nfeat, nclass_p)   b_ref: (1, nclass_p)
    acc = jnp.dot(x_ref[...], w_ref[...], preferred_element_type=jnp.float32)
    o_ref[...] = (acc + b_ref[...]).astype(o_ref.dtype)


def sgc_kernel_ktiled(x_ref, w_ref, b_ref, o_ref, acc_ref):
    # grid = (row_tiles, k_tiles); the K axis is the last ("arbitrary") axis.
    k = pl.program_id(1)

    @pl.when(k == 0)
    def _():
        acc_ref[...] = jnp.zeros_like(acc_ref)

    acc_ref[...] += jnp.dot(x_ref[...], w_ref[...],
                            preferred_element_type=jnp.float32)

    @pl.when(k == pl.num_programs(1) - 1)
    def _():
        o_ref[...] = (acc_ref[...] + b_ref[...]).astype(o_ref.dtype)


# ---------------------------------------------------------------------------
# Hardware query (done once; generation-aware budgets)
# ---------------------------------------------------------------------------
@functools.lru_cache(maxsize=1)
def _tpu_budget_and_cores():
    """Returns (usable VMEM budget in bytes, is_two_tensorcore_part)."""
    vmem_cap = None
    try:
        vmem_cap = int(getattr(pltpu.get_tpu_info(), "vmem_capacity_bytes"))
    except Exception:
        vmem_cap = None

    two_tc = False
    try:
        kind = jax.devices()[0].device_kind.lower()
        two_tc = "7" in kind  # v7x-class parts: 2 TensorCores / chip
    except Exception:
        pass

    if vmem_cap is None:
        # Conservative fallback that is safe on every generation (incl. v7x).
        budget = 48 * 1024 * 1024
    else:
        # Leave ~16 MiB headroom for compiler-internal scratch:
        #   v7x 64 MiB -> ~48 MiB usable; v5e/v6e 128 MiB -> ~112 MiB usable.
        budget = max(vmem_cap - 16 * 1024 * 1024, 32 * 1024 * 1024)
    return budget, two_tc


# ---------------------------------------------------------------------------
# One-time parameter preparation (call at setup, NOT per forward)
# ---------------------------------------------------------------------------
def prepare_params(weight, bias, *, pad_lanes=None):
    """weight: (nclass, nfeat) nn.Linear layout; bias: (nclass,).

    Returns (w_t, b2d, nclass):
      w_t: (nfeat, nclass_p)  W^T, optionally zero-padded on the class (lane)
                              dim to a multiple of 128 -> unmasked lane-dense
                              output stores.
      b2d: (1, nclass_p)
      nclass: true output width (for lane slicing after the kernel).
    """
    nclass, nfeat = weight.shape
    if pad_lanes is None:
        # Sub-128 output last dim forces masked vst.msk partial stores (the
        # single biggest out_spec lever). Once nfeat >= 128 the extra output
        # write bytes are negligible vs the dominant x read stream.
        pad_lanes = (nclass % 128 != 0) and (nfeat >= 128)
    w_t = weight.T                      # hoisted: happens once, not per call
    b2d = bias.reshape(1, nclass)
    if pad_lanes:
        nclass_p = _round_up(nclass, 128)
        w_t = jnp.pad(w_t, ((0, 0), (0, nclass_p - nclass)))
        b2d = jnp.pad(b2d, ((0, 0), (0, nclass_p - nclass)))
    return w_t, b2d, nclass


# ---------------------------------------------------------------------------
# Forward
# ---------------------------------------------------------------------------
def sgc_forward(x, w_t, b2d, nclass=None, *, tm=1024, force_tk=None):
    """y = x @ W.T + b (nn.Linear semantics) with prepared params.

    x:   (N, nfeat)          f32 (or bf16 produced upstream; f32 accumulation)
    w_t: (nfeat, nclass_p)   from prepare_params
    b2d: (1, nclass_p)       from prepare_params
    nclass: true output width (defaults to nclass_p)
    force_tk: force the K-tiled path with this feature tile (testing / tuning)
    returns (N, nclass) in x.dtype
    """
    N, nfeat = x.shape
    assert w_t.shape[0] == nfeat, "w_t must be (nfeat, nclass_p)"
    nclass_p = w_t.shape[1]
    if nclass is None:
        nclass = nclass_p

    x_is = jnp.dtype(x.dtype).itemsize
    w_is = jnp.dtype(w_t.dtype).itemsize

    budget, two_tc = _tpu_budget_and_cores()

    # ---- balanced row tiling: NO wrapper-side padding of x -----------------
    tm_req = max(8, min(tm, _round_up(N, 8)))
    n_steps = _cdiv(N, tm_req)
    if two_tc and n_steps == 1 and N >= 16:
        n_steps = 2                     # keep both v7x TensorCores busy
    if n_steps == 1:
        tm_eff = N                      # single block == full row dim (legal)
    else:
        tm_eff = _round_up(_cdiv(N, n_steps), 8)
        n_steps = _cdiv(N, tm_eff)      # last block may be ragged (masked)

    # ---- VMEM footprint models ---------------------------------------------
    def fullk_bytes(tm_):
        # x (2 bufs) + out (2 bufs) + resident W^T (1 buf) + bias (1 buf)
        return (2 * tm_ * nfeat * x_is + 2 * tm_ * nclass_p * x_is
                + nfeat * nclass_p * w_is + nclass_p * 4)

    def ktile_bytes(tm_, tk_):
        # x (2) + W tile (2) + out (2) + f32 acc scratch + bias
        return (2 * tm_ * tk_ * x_is + 2 * tk_ * nclass_p * w_is
                + 2 * tm_ * nclass_p * x_is + tm_ * nclass_p * 4 + nclass_p * 4)

    # ---- choose plan: resident-W^T full-K, or K-tiled fallback -------------
    tk = None
    if force_tk is not None:
        if force_tk % 128 == 0 and nfeat % force_tk == 0:
            tk = int(force_tk)
    elif fullk_bytes(tm_eff) > budget:
        # First try shrinking the row tile while keeping W^T resident.
        tm_try = tm_eff
        while tm_try > 256 and fullk_bytes(tm_try) > budget:
            tm_try = max(256, _round_up(tm_try // 2, 8))
        if fullk_bytes(tm_try) <= budget:
            tm_eff = tm_try
            n_steps = _cdiv(N, tm_eff)
        else:
            # W^T itself is too big to sit in VMEM: tile the feature (K) axis.
            for cand in (2048, 1024, 512, 256, 128):
                if nfeat % cand == 0 and ktile_bytes(tm_eff, cand) <= budget:
                    tk = cand
                    break
            if tk is None:
                # TODO(synk): ragged-K tiling (needs zero-padded K in W^T) for
                # nfeat that has no 128-multiple divisor; fall back to a small
                # full-K tile and let the compiler try.
                tm_eff = max(8, _round_up(min(tm_eff, 256), 8))
                n_steps = _cdiv(N, tm_eff)

    cost = pl.CostEstimate(
        flops=2 * N * nfeat * nclass_p,
        bytes_accessed=(N * nfeat * x_is + nfeat * nclass_p * w_is
                        + N * nclass_p * x_is),
        transcendentals=0,
    )

    out_shape = jax.ShapeDtypeStruct((N, nclass_p), x.dtype)

    if tk is None:
        grid_spec = pltpu.PrefetchScalarGridSpec(
            num_scalar_prefetch=0,
            grid=(n_steps,),
            in_specs=[
                # x row tile: streamed, double-buffered (default).
                pl.BlockSpec((tm_eff, nfeat), lambda i: (i, 0)),
                # Resident W^T: constant block -> single buffer.
                pl.BlockSpec((nfeat, nclass_p), lambda i: (0, 0),
                             pipeline_mode=pl.Buffered(1)),
                # Bias: constant block -> single buffer.
                pl.BlockSpec((1, nclass_p), lambda i: (0, 0),
                             pipeline_mode=pl.Buffered(1)),
            ],
            out_specs=pl.BlockSpec((tm_eff, nclass_p), lambda i: (i, 0)),
        )
        kernel = sgc_kernel_fullk
        dim_sem = ("parallel",)
    else:
        grid_spec = pltpu.PrefetchScalarGridSpec(
            num_scalar_prefetch=0,
            grid=(n_steps, nfeat // tk),
            in_specs=[
                pl.BlockSpec((tm_eff, tk), lambda i, k: (i, k)),
                pl.BlockSpec((tk, nclass_p), lambda i, k: (k, 0)),
                pl.BlockSpec((1, nclass_p), lambda i, k: (0, 0),
                             pipeline_mode=pl.Buffered(1)),
            ],
            out_specs=pl.BlockSpec((tm_eff, nclass_p), lambda i, k: (i, 0)),
            scratch_shapes=[pltpu.VMEM((tm_eff, nclass_p), jnp.float32)],
        )
        kernel = sgc_kernel_ktiled
        dim_sem = ("parallel", "arbitrary")

    out = pl.pallas_call(
        kernel,
        out_shape=out_shape,
        grid_spec=grid_spec,
        compiler_params=pltpu.CompilerParams(
            dimension_semantics=dim_sem,
            vmem_limit_bytes=int(budget),
        ),
        cost_estimate=cost,
    )(x, w_t, b2d)

    if nclass_p != nclass:
        out = out[:, :nclass]
    return out


if __name__ == "__main__":
    key = jax.random.PRNGKey(0)
    kx, kw, kb, kx2, kw2, kb2 = jax.random.split(key, 6)

    # ---- Test 1: toy shapes; N not a multiple of 8, nfeat/nclass < 128 -----
    N, nfeat, nclass = 200, 32, 16
    x = jax.random.normal(kx, (N, nfeat), dtype=jnp.float32)
    weight = jax.random.normal(kw, (nclass, nfeat), dtype=jnp.float32) * 0.1
    bias = jax.random.normal(kb, (nclass,), dtype=jnp.float32) * 0.1
    y_ref = x @ weight.T + bias

    w_t, b2d, out_dim = prepare_params(weight, bias)   # transpose hoisted once
    y = jax.block_until_ready(sgc_forward(x, w_t, b2d, out_dim))
    assert y.shape == (N, nclass)
    assert jnp.allclose(y, y_ref, atol=1e-5, rtol=1e-5), "mismatch (default)"

    # ---- Test 2: ragged multi-tile rows (masked edge writes, no x pad) -----
    y2 = jax.block_until_ready(sgc_forward(x, w_t, b2d, out_dim, tm=64))
    assert jnp.allclose(y2, y_ref, atol=1e-5, rtol=1e-5), "mismatch (ragged)"

    # ---- Test 3: lane-padded (nclass -> 128) lane-dense store path ---------
    w_t_p, b2d_p, out_dim_p = prepare_params(weight, bias, pad_lanes=True)
    y3 = jax.block_until_ready(sgc_forward(x, w_t_p, b2d_p, out_dim_p))
    assert y3.shape == (N, nclass)
    assert jnp.allclose(y3, y_ref, atol=1e-5, rtol=1e-5), "mismatch (padded)"

    # ---- Test 4: K-tiled fallback path (accumulator + pl.when) -------------
    nfeat2, nclass2 = 512, 16
    x4 = jax.random.normal(kx2, (N, nfeat2), dtype=jnp.float32)
    weight4 = jax.random.normal(kw2, (nclass2, nfeat2), dtype=jnp.float32) * 0.05
    bias4 = jax.random.normal(kb2, (nclass2,), dtype=jnp.float32) * 0.1
    y4_ref = x4 @ weight4.T + bias4
    w_t4, b2d4, out_dim4 = prepare_params(weight4, bias4)  # lane-pads to 128
    y4 = jax.block_until_ready(sgc_forward(x4, w_t4, b2d4, out_dim4,
                                           force_tk=128))
    assert y4.shape == (N, nclass2)
    assert jnp.allclose(y4, y4_ref, atol=1e-3, rtol=1e-3), "mismatch (K-tiled)"

    print("KERNEL_OK")
</pallas_src>

<mosaic_0001>
module attributes {stable_mosaic.version = 11 : i64} {
  func.func @sgc_kernel_fullk(%arg0: i32, %arg1: memref<200x32xf32, #tpu.memory_space<vmem>>, %arg2: memref<32x16xf32, #tpu.memory_space<vmem>>, %arg3: memref<1x16xf32, #tpu.memory_space<vmem>>, %arg4: memref<200x16xf32, #tpu.memory_space<vmem>>) attributes {dimension_semantics = [#tpu.dimension_semantics<parallel>], iteration_bounds = array<i64: 1>, scalar_prefetch = 0 : i64, scratch_operands = 0 : i64, tpu.core_type = #tpu.core_type<tc>, window_params = [{transform_indices = @transform_0, window_bounds = array<i64: 200, 32>}, {pipeline_mode = #tpu.pipeline_mode<synchronous>, transform_indices = @transform_1, window_bounds = array<i64: 32, 16>}, {pipeline_mode = #tpu.pipeline_mode<synchronous>, transform_indices = @transform_2, window_bounds = array<i64: 1, 16>}, {transform_indices = @transform_3, window_bounds = array<i64: 200, 16>}]} {
    %c0 = arith.constant 0 : index
    %c0_0 = arith.constant 0 : index
    %0 = vector.load %arg1[%c0, %c0_0] : memref<200x32xf32, #tpu.memory_space<vmem>>, vector<200x32xf32>
    %c0_1 = arith.constant 0 : index
    %c0_2 = arith.constant 0 : index
    %1 = vector.load %arg2[%c0_1, %c0_2] : memref<32x16xf32, #tpu.memory_space<vmem>>, vector<32x16xf32>
    %cst = arith.constant dense<0.000000e+00> : vector<200x16xf32>
    %2 = tpu.matmul %0, %1, %cst {dimension_numbers = #tpu.dot_dimension_numbers<[1], [0], [0], [1], [0, 0, 1, 1], [], []>} : vector<200x32xf32>, vector<32x16xf32>, vector<200x16xf32> -> vector<200x16xf32>
    %c0_3 = arith.constant 0 : index
    %c0_4 = arith.constant 0 : index
    %3 = vector.load %arg3[%c0_3, %c0_4] : memref<1x16xf32, #tpu.memory_space<vmem>>, vector<1x16xf32>
    %4 = vector.broadcast %3 : vector<1x16xf32> to vector<200x16xf32>
    %5 = arith.addf %2, %4 : vector<200x16xf32>
    %c0_5 = arith.constant 0 : index
    %c0_6 = arith.constant 0 : index
    %6 = vector.load %arg4[%c0_5, %c0_6] : memref<200x16xf32, #tpu.memory_space<vmem>>, vector<200x16xf32>
    tpu.vector_store %arg4[%c0_5, %c0_6], %5 {strides = array<i32>} : memref<200x16xf32, #tpu.memory_space<vmem>>, vector<200x16xf32>,
    return
  }
  func.func @transform_0(%arg0: i32) -> (i32, i32) {
    %c0_i32 = arith.constant 0 : i32
    %c0_i32_0 = arith.constant 0 : i32
    return %arg0, %c0_i32 : i32, i32
  }
  func.func @transform_1(%arg0: i32) -> (i32, i32) {
    %c0_i32 = arith.constant 0 : i32
    %c0_i32_0 = arith.constant 0 : i32
    %c0_i32_1 = arith.constant 0 : i32
    return %c0_i32, %c0_i32_0 : i32, i32
  }
  func.func @transform_2(%arg0: i32) -> (i32, i32) {
    %c0_i32 = arith.constant 0 : i32
    %c0_i32_0 = arith.constant 0 : i32
    %c0_i32_1 = arith.constant 0 : i32
    return %c0_i32, %c0_i32_0 : i32, i32
  }
  func.func @transform_3(%arg0: i32) -> (i32, i32) {
    %c0_i32 = arith.constant 0 : i32
    %c0_i32_0 = arith.constant 0 : i32
    return %arg0, %c0_i32 : i32, i32
  }
}

</mosaic_0001>

<bundles_post_ra>
// kernel: tpu_custom_call.1
= control target key start
LH: loop header
LB: loop body
LE: loop exit
PB: predicated region body
PF: predicated region fallthrough
CT: control target
= control target key end

     0   :  { %v494_v0 = vmov 0.0   ;;  %vm50_vm0 = vcmask 261120   ;;  %vm495_vm1 = vmmov 0   ;;  %vm316_vm2 = vcmask 130048   ;;  %s816_s1 = inlined_call_operand.vmem [shape: f32[32,16], index: 1, kind: input, shape index: {}]   ;;  %s817_s0 = inlined_call_operand.vmem [shape: f32[200,32], index: 0, kind: input, shape index: {}]   ;;  %s818_s2 = inlined_call_operand.vmem [shape: f32[1,16], index: 2, kind: input, shape index: {}]   ;;  %s819_s3 = inlined_call_operand.vmem [shape: f32[200,16], index: 3, kind: output, shape index: {}]  }
   0x1   :  { %401 = vmatprep.subr.mxu0 %v494_v0  ;;  %v42_v1 = vld [vmem:[%s816_s1 + $0x18] sm:$0xff]  ;;  %484 = vmatprep.subr.mxu1 %v494_v0  ;;  %v41_v2 = vld [vmem:[%s816_s1 + $0x10] sm:$0xff]  ;;  %v40_v3 = vld [vmem:[%s816_s1 + $0x8] sm:$0xff] }
   0x2   :  { %402 = vmatpush3.msra.mxu0 %v42_v1  ;;  %488 = vmatpush3.msra.mxu1 %v42_v1  ;;  %v39_v4 = vld [vmem:[%s816_s1] sm:$0xff]  ;;  %v27_v6 = vld [vmem:[%s817_s0 + $0x68] sm:$0xff]  ;;  %v28_v8 = vld [vmem:[%s817_s0 + $0x70] sm:$0xff] }
   0x3   :  { %403 = vmatprep.subr.mxu0 %v494_v0  ;;  %485 = vmatprep.subr.mxu1 %v494_v0  ;;  %v14_v5 = vld [vmem:[%s817_s0] sm:$0xff]  ;;  %v15_v7 = vld [vmem:[%s817_s0 + $0x8] sm:$0xff]  ;;  %v16_v9 = vld [vmem:[%s817_s0 + $0x10] sm:$0xff] }
   0x4   :  { %404 = vmatpush3.msra.mxu0 %v41_v2  ;;  %489 = vmatpush3.msra.mxu1 %v41_v2  ;;  %v29_v10 = vld [vmem:[%s817_s0 + $0x78] sm:$0xff]  ;;  %v30_v12 = vld [vmem:[%s817_s0 + $0x80] sm:$0xff]  ;;  %v31_v14 = vld [vmem:[%s817_s0 + $0x88] sm:$0xff] }
   0x5   :  { %405 = vmatprep.subr.mxu0 %v494_v0  ;;  %486 = vmatprep.subr.mxu1 %v494_v0  ;;  %v17_v11 = vld [vmem:[%s817_s0 + $0x18] sm:$0xff]  ;;  %v18_v13 = vld [vmem:[%s817_s0 + $0x20] sm:$0xff]  ;;  %v19_v15 = vld [vmem:[%s817_s0 + $0x28] sm:$0xff] }
   0x6   :  { %406 = vmatpush3.msra.mxu0 %v40_v3  ;;  %490 = vmatpush3.msra.mxu1 %v40_v3  ;;  %v32_v16 = vld [vmem:[%s817_s0 + $0x90] sm:$0xff]  ;;  %v33_v18 = vld [vmem:[%s817_s0 + $0x98] sm:$0xff]  ;;  %v34_v20 = vld [vmem:[%s817_s0 + $0xa0] sm:$0xff] }
   0x7   :  { %407 = vmatprep.subr.mxu0 %v494_v0  ;;  %409 = vmatprep.mubr.msk.f32.mxu0 %vm495_vm1, %v494_v0  ;;  %v20_v17 = vld [vmem:[%s817_s0 + $0x30] sm:$0xff]  ;;  %v21_v19 = vld [vmem:[%s817_s0 + $0x38] sm:$0xff]  ;;  %v22_v21 = vld [vmem:[%s817_s0 + $0x40] sm:$0xff] }
   0x8   :  { %408 = vmatpush3.msra.mxu0 %v39_v4  ;;  %487 = vmatprep.subr.mxu1 %v494_v0  ;;  %v35_v22 = vld [vmem:[%s817_s0 + $0xa8] sm:$0xff]  ;;  %v36_v24 = vld [vmem:[%s817_s0 + $0xb0] sm:$0xff]  ;;  %v37_v26 = vld [vmem:[%s817_s0 + $0xb8] sm:$0xff] }
   0x9   :  { %410 = vmatmul.mubr.msk.f32.vlgmr.msra.gmra.mxu0 %vm50_vm0, %v14_v5  ;;  %491 = vmatpush3.msra.mxu1 %v39_v4  ;;  %v23_v23 = vld [vmem:[%s817_s0 + $0x48] sm:$0xff]  ;;  %v24_v25 = vld [vmem:[%s817_s0 + $0x50] sm:$0xff]  ;;  %v25_v27 = vld [vmem:[%s817_s0 + $0x58] sm:$0xff] }
   0xa   :  { %448 = vmatprep.mubr.msk.f32.mxu1 %vm495_vm1, %v494_v0  ;;  %412 = vmatprep.mubr.msk.f32.mxu0 %vm495_vm1, %v494_v0  ;;  %v38_v28 = vld [vmem:[%s817_s0 + $0xc0] sm:$0xff] }
   0xb   :  { %449 = vmatmul.mubr.msk.f32.vlgmr.msra.gmra.mxu1 %vm50_vm0, %v27_v6  ;;  %v26_v29 = vld [vmem:[%s817_s0 + $0x60] sm:$0xff] }
   0xc   :  { %451 = vmatprep.mubr.msk.f32.mxu1 %vm495_vm1, %v494_v0  ;;  %v689_v30 = vld [vmem:[%s818_s2] ss:$0 sm:$0xff] }
   0xd   :  { %413 = vmatmul.mubr.msk.f32.gmra.mxu0 %vm50_vm0, %v15_v7 }
   0xe   :  { %415 = vmatprep.mubr.msk.f32.mxu0 %vm495_vm1, %v494_v0 }
   0xf   :  { %452 = vmatmul.mubr.msk.f32.gmra.mxu1 %vm50_vm0, %v28_v8 }
  0x10   :  { %454 = vmatprep.mubr.msk.f32.mxu1 %vm495_vm1, %v494_v0 }
  0x11   :  { %416 = vmatmul.mubr.msk.f32.gmra.mxu0 %vm50_vm0, %v16_v9 }
  0x12   :  { %418 = vmatprep.mubr.msk.f32.mxu0 %vm495_vm1, %v494_v0 }
  0x13   :  { %455 = vmatmul.mubr.msk.f32.gmra.mxu1 %vm50_vm0, %v29_v10 }
  0x14   :  { %457 = vmatprep.mubr.msk.f32.mxu1 %vm495_vm1, %v494_v0 }
  0x15   :  { %419 = vmatmul.mubr.msk.f32.gmra.mxu0 %vm50_vm0, %v17_v11 }
  0x16   :  { %421 = vmatprep.mubr.msk.f32.mxu0 %vm495_vm1, %v494_v0 }
  0x17   :  { %458 = vmatmul.mubr.msk.f32.gmra.mxu1 %vm50_vm0, %v30_v12 }
  0x18   :  { %460 = vmatprep.mubr.msk.f32.mxu1 %vm495_vm1, %v494_v0 }
  0x19   :  { %422 = vmatmul.mubr.msk.f32.gmra.mxu0 %vm50_vm0, %v18_v13 }
  0x1a   :  { %424 = vmatprep.mubr.msk.f32.mxu0 %vm495_vm1, %v494_v0 }
  0x1b   :  { %461 = vmatmul.mubr.msk.f32.gmra.mxu1 %vm50_vm0, %v31_v14 }
  0x1c   :  { %463 = vmatprep.mubr.msk.f32.mxu1 %vm495_vm1, %v494_v0 }
  0x1d   :  { %425 = vmatmul.mubr.msk.f32.gmra.mxu0 %vm50_vm0, %v19_v15 }
  0x1e   :  { %427 = vmatprep.mubr.msk.f32.mxu0 %vm495_vm1, %v494_v0 }
  0x1f   :  { %464 = vmatmul.mubr.msk.f32.gmra.mxu1 %vm50_vm0, %v32_v16 }
  0x20   :  { %466 = vmatprep.mubr.msk.f32.mxu1 %vm495_vm1, %v494_v0 }
  0x21   :  { %428 = vmatmul.mubr.msk.f32.gmra.mxu0 %vm50_vm0, %v20_v17 }
  0x22   :  { %430 = vmatprep.mubr.msk.f32.mxu0 %vm495_vm1, %v494_v0 }
  0x23   :  { %467 = vmatmul.mubr.msk.f32.gmra.mxu1 %vm50_vm0, %v33_v18 }
  0x24   :  { %469 = vmatprep.mubr.msk.f32.mxu1 %vm495_vm1, %v494_v0 }
  0x25   :  { %431 = vmatmul.mubr.msk.f32.gmra.mxu0 %vm50_vm0, %v21_v19 }
  0x26   :  { %433 = vmatprep.mubr.msk.f32.mxu0 %vm495_vm1, %v494_v0 }
  0x27   :  { %470 = vmatmul.mubr.msk.f32.gmra.mxu1 %vm50_vm0, %v34_v20 }
  0x28   :  { %472 = vmatprep.mubr.msk.f32.mxu1 %vm495_vm1, %v494_v0 }
  0x29   :  { %434 = vmatmul.mubr.msk.f32.gmra.mxu0 %vm50_vm0, %v22_v21 }
  0x2a   :  { %436 = vmatprep.mubr.msk.f32.mxu0 %vm495_vm1, %v494_v0 }
  0x2b   :  { %473 = vmatmul.mubr.msk.f32.gmra.mxu1 %vm50_vm0, %v35_v22 }
  0x2c   :  { %475 = vmatprep.mubr.msk.f32.mxu1 %vm495_vm1, %v494_v0 }
  0x2d   :  { %437 = vmatmul.mubr.msk.f32.gmra.mxu0 %vm50_vm0, %v23_v23 }
  0x2e   :  { %439 = vmatprep.mubr.msk.f32.mxu0 %vm495_vm1, %v494_v0 }
  0x2f   :  { %476 = vmatmul.mubr.msk.f32.gmra.mxu1 %vm50_vm0, %v36_v24 }
  0x30   :  { %478 = vmatprep.mubr.msk.f32.mxu1 %vm495_vm1, %v494_v0 }
  0x31   :  { %440 = vmatmul.mubr.msk.f32.gmra.mxu0 %vm50_vm0, %v24_v25 }
  0x32   :  { %442 = vmatprep.mubr.msk.f32.mxu0 %vm495_vm1, %v494_v0 }
  0x33   :  { %479 = vmatmul.mubr.msk.f32.gmra.mxu1 %vm50_vm0, %v37_v26 }
  0x34   :  { %481 = vmatprep.mubr.msk.f32.mxu1 %vm495_vm1, %v494_v0 }
  0x35   :  { %443 = vmatmul.mubr.msk.f32.gmra.mxu0 %vm50_vm0, %v25_v27 }
  0x36   :  { %445 = vmatprep.mubr.msk.f32.mxu0 %vm495_vm1, %v494_v0 }
  0x37   :  { %482 = vmatmul.mubr.msk.f32.gmra.mxu1 %vm50_vm0, %v38_v28 }
  0x39   :  { %446 = vmatmul.mubr.msk.f32.gmra.mxu0 %vm50_vm0, %v26_v29 }
  0xc9   :  { %v192_v31 = vpop.f32.mrf.mxu0 }
  0xca   :  { %v193_v32 = vadd.f32 %v689_v30, %v192_v31 }
  0xcb   :  { %v411_v33 = vpop.f32.mrf.mxu0  ;;  %v257_v34 = vpop.f32.mrf.mxu1 }
  0xcc   :  { %317 = vst.msk [vmem:[%s819_s3] sm:$0xff] %vm316_vm2, %v193_v32  ;;  %v258_v35 = vadd.f32 %v689_v30, %v257_v34 }
  0xcd   :  { %v197_v36 = vpop.f32.mrf.mxu0  ;;  %v450_v37 = vpop.f32.mrf.mxu1 }
  0xce   :  { %330 = vst.msk [vmem:[%s819_s3 + $0x68] sm:$0xff] %vm316_vm2, %v258_v35  ;;  %v198_v38 = vadd.f32 %v689_v30, %v197_v36 }
  0xcf   :  { %v414_v39 = vpop.f32.mrf.mxu0  ;;  %v262_v40 = vpop.f32.mrf.mxu1 }
  0xd0   :  { %318 = vst.msk [vmem:[%s819_s3 + $0x8] sm:$0xff] %vm316_vm2, %v198_v38  ;;  %v263_v41 = vadd.f32 %v689_v30, %v262_v40 }
  0xd1   :  { %v202_v42 = vpop.f32.mrf.mxu0  ;;  %v453_v43 = vpop.f32.mrf.mxu1 }
  0xd2   :  { %331 = vst.msk [vmem:[%s819_s3 + $0x70] sm:$0xff] %vm316_vm2, %v263_v41  ;;  %v203_v44 = vadd.f32 %v689_v30, %v202_v42 }
  0xd3   :  { %v417_v45 = vpop.f32.mrf.mxu0  ;;  %v267_v46 = vpop.f32.mrf.mxu1 }
  0xd4   :  { %319 = vst.msk [vmem:[%s819_s3 + $0x10] sm:$0xff] %vm316_vm2, %v203_v44  ;;  %v268_v47 = vadd.f32 %v689_v30, %v267_v46 }
  0xd5   :  { %v207_v48 = vpop.f32.mrf.mxu0  ;;  %v456_v49 = vpop.f32.mrf.mxu1 }
  0xd6   :  { %332 = vst.msk [vmem:[%s819_s3 + $0x78] sm:$0xff] %vm316_vm2, %v268_v47  ;;  %v208_v50 = vadd.f32 %v689_v30, %v207_v48 }
  0xd7   :  { %v420_v51 = vpop.f32.mrf.mxu0  ;;  %v272_v52 = vpop.f32.mrf.mxu1 }
  0xd8   :  { %320 = vst.msk [vmem:[%s819_s3 + $0x18] sm:$0xff] %vm316_vm2, %v208_v50  ;;  %v273_v53 = vadd.f32 %v689_v30, %v272_v52 }
  0xd9   :  { %v212_v54 = vpop.f32.mrf.mxu0  ;;  %v459_v55 = vpop.f32.mrf.mxu1 }
  0xda   :  { %333 = vst.msk [vmem:[%s819_s3 + $0x80] sm:$0xff] %vm316_vm2, %v273_v53  ;;  %v213_v56 = vadd.f32 %v689_v30, %v212_v54 }
  0xdb   :  { %v423_v57 = vpop.f32.mrf.mxu0  ;;  %v277_v58 = vpop.f32.mrf.mxu1 }
  0xdc   :  { %321 = vst.msk [vmem:[%s819_s3 + $0x20] sm:$0xff] %vm316_vm2, %v213_v56  ;;  %v278_v59 = vadd.f32 %v689_v30, %v277_v58 }
  0xdd   :  { %v217_v60 = vpop.f32.mrf.mxu0  ;;  %v462_v61 = vpop.f32.mrf.mxu1 }
  0xde   :  { %334 = vst.msk [vmem:[%s819_s3 + $0x88] sm:$0xff] %vm316_vm2, %v278_v59  ;;  %v218_v62 = vadd.f32 %v689_v30, %v217_v60 }
  0xdf   :  { %v426_v63 = vpop.f32.mrf.mxu0  ;;  %v282_v0 = vpop.f32.mrf.mxu1 }
  0xe0   :  { %322 = vst.msk [vmem:[%s819_s3 + $0x28] sm:$0xff] %vm316_vm2, %v218_v62  ;;  %v283_v1 = vadd.f32 %v689_v30, %v282_v0 }
  0xe1   :  { %v222_v2 = vpop.f32.mrf.mxu0  ;;  %v465_v3 = vpop.f32.mrf.mxu1 }
  0xe2   :  { %335 = vst.msk [vmem:[%s819_s3 + $0x90] sm:$0xff] %vm316_vm2, %v283_v1  ;;  %v223_v4 = vadd.f32 %v689_v30, %v222_v2 }
  0xe3   :  { %v429_v5 = vpop.f32.mrf.mxu0  ;;  %v287_v6 = vpop.f32.mrf.mxu1 }
  0xe4   :  { %323 = vst.msk [vmem:[%s819_s3 + $0x30] sm:$0xff] %vm316_vm2, %v223_v4  ;;  %v288_v7 = vadd.f32 %v689_v30, %v287_v6 }
  0xe5   :  { %v227_v8 = vpop.f32.mrf.mxu0  ;;  %v468_v9 = vpop.f32.mrf.mxu1 }
  0xe6   :  { %336 = vst.msk [vmem:[%s819_s3 + $0x98] sm:$0xff] %vm316_vm2, %v288_v7  ;;  %v228_v10 = vadd.f32 %v689_v30, %v227_v8 }
  0xe7   :  { %v432_v11 = vpop.f32.mrf.mxu0  ;;  %v292_v12 = vpop.f32.mrf.mxu1 }
  0xe8   :  { %324 = vst.msk [vmem:[%s819_s3 + $0x38] sm:$0xff] %vm316_vm2, %v228_v10  ;;  %v293_v13 = vadd.f32 %v689_v30, %v292_v12 }
  0xe9   :  { %v232_v14 = vpop.f32.mrf.mxu0  ;;  %v471_v15 = vpop.f32.mrf.mxu1 }
  0xea   :  { %337 = vst.msk [vmem:[%s819_s3 + $0xa0] sm:$0xff] %vm316_vm2, %v293_v13  ;;  %v233_v16 = vadd.f32 %v689_v30, %v232_v14 }
  0xeb   :  { %v435_v17 = vpop.f32.mrf.mxu0  ;;  %v297_v18 = vpop.f32.mrf.mxu1 }
  0xec   :  { %325 = vst.msk [vmem:[%s819_s3 + $0x40] sm:$0xff] %vm316_vm2, %v233_v16  ;;  %v298_v19 = vadd.f32 %v689_v30, %v297_v18 }
  0xed   :  { %v237_v20 = vpop.f32.mrf.mxu0  ;;  %v474_v21 = vpop.f32.mrf.mxu1 }
  0xee   :  { %338 = vst.msk [vmem:[%s819_s3 + $0xa8] sm:$0xff] %vm316_vm2, %v298_v19  ;;  %v238_v22 = vadd.f32 %v689_v30, %v237_v20 }
  0xef   :  { %v438_v23 = vpop.f32.mrf.mxu0  ;;  %v302_v24 = vpop.f32.mrf.mxu1 }
  0xf0   :  { %326 = vst.msk [vmem:[%s819_s3 + $0x48] sm:$0xff] %vm316_vm2, %v238_v22  ;;  %v303_v25 = vadd.f32 %v689_v30, %v302_v24 }
  0xf1   :  { %v242_v26 = vpop.f32.mrf.mxu0  ;;  %v477_v27 = vpop.f32.mrf.mxu1 }
  0xf2   :  { %339 = vst.msk [vmem:[%s819_s3 + $0xb0] sm:$0xff] %vm316_vm2, %v303_v25  ;;  %v243_v28 = vadd.f32 %v689_v30, %v242_v26 }
  0xf3   :  { %v441_v29 = vpop.f32.mrf.mxu0  ;;  %v307_v31 = vpop.f32.mrf.mxu1 }
  0xf4   :  { %327 = vst.msk [vmem:[%s819_s3 + $0x50] sm:$0xff] %vm316_vm2, %v243_v28  ;;  %v308_v32 = vadd.f32 %v689_v30, %v307_v31 }
  0xf5   :  { %v247_v33 = vpop.f32.mrf.mxu0  ;;  %v480_v34 = vpop.f32.mrf.mxu1 }
  0xf6   :  { %340 = vst.msk [vmem:[%s819_s3 + $0xb8] sm:$0xff] %vm316_vm2, %v308_v32  ;;  %v248_v35 = vadd.f32 %v689_v30, %v247_v33 }
  0xf7   :  { %v444_v36 = vpop.f32.mrf.mxu0  ;;  %v312_v37 = vpop.f32.mrf.mxu1 }
  0xf8   :  { %328 = vst.msk [vmem:[%s819_s3 + $0x58] sm:$0xff] %vm316_vm2, %v248_v35  ;;  %v313_v38 = vadd.f32 %v689_v30, %v312_v37 }
  0xf9   :  { %v252_v39 = vpop.f32.mrf.mxu0  ;;  %v483_v40 = vpop.f32.mrf.mxu1 }
  0xfa   :  { %341 = vst.msk [vmem:[%s819_s3 + $0xc0] sm:$0xff] %vm316_vm2, %v313_v38  ;;  %v253_v41 = vadd.f32 %v689_v30, %v252_v39 }
  0xfb   :  { %v447_v42 = vpop.f32.mrf.mxu0 }
  0xfc   :  { %329 = vst.msk [vmem:[%s819_s3 + $0x60] sm:$0xff] %vm316_vm2, %v253_v41 }

</bundles_post_ra>
